<compile_context>
chip_gen: v7x
topology: tpu7x:2x2x1
jax: 0.10.0
libtpu: 0.0.40
codegen_flags: <defaults>
</compile_context>

<pallas_src>
import jax
import jax.numpy as jnp
from jax.experimental import pallas as pl
from jax.experimental.pallas import tpu as pltpu

SUBLANE = 8  # f32 vreg sublane count


def _round_up(x, m):
    return (x + m - 1) // m * m


def _choose_tile_b(B, tile_b):
    """Pick a row tile.

    - Tiny batches: a single full-extent block (always a legal block shape,
      no padding/masking at all).
    - Otherwise: multiple of 8 rows (sublane constraint), capped at `tile_b`,
      and shrunk until the grid has >= 2 steps so the 'parallel' axis can be
      sharded across v7x's two TensorCores (no-op on v5e/v6e).
    """
    if B <= 2 * SUBLANE:
        return B
    tile = min(_round_up(tile_b, SUBLANE), _round_up(B, SUBLANE))
    while tile > SUBLANE and pl.cdiv(B, tile) < 2:
        tile = _round_up(tile // 2, SUBLANE)
    return tile


def _model_kernel(x1_ref, x2_ref, wt_ref, b_ref, o_ref):
    """out = sqrt(x2) + (x2 @ W_t) + b - x1 on one row tile."""
    x2 = x2_ref[...]                                   # (tile_b, D)
    v1 = jnp.sqrt(x2)                                  # VPU/EUP elementwise
    # Plain last-dim x first-dim contraction on the pre-transposed weight:
    # (tile_b, D) @ (D, D) -> (tile_b, D); no in-kernel transpose.
    v2 = jnp.dot(x2, wt_ref[...], preferred_element_type=jnp.float32)
    # Bias folded into the single elementwise epilogue (one broadcast).
    o_ref[...] = (v1 + v2 + b_ref[...] - x1_ref[...]).astype(o_ref.dtype)


def model_forward(x1, x2, w, b, *, tile_b=2048):
    """x1: (B, D), x2: (B, D), w: (D_out, D_in) torch layout, b: (D_out,)."""
    B, d_in = x2.shape
    d_out = w.shape[0]
    assert d_out == d_in, "see TODO(synk): out_features forced to in_features"
    D = d_in

    # One-time, negligible wrapper-side ops (NOT per-step work):
    w_t = jnp.transpose(w)            # (D_in, D_out) so kernel contraction is plain
    b2 = b.reshape(1, D)              # (1, D) bias row, VMEM-resident

    tile = _choose_tile_b(B, tile_b)
    grid = (pl.cdiv(B, tile),)

    itemsize = jnp.dtype(x1.dtype).itemsize
    cost = pl.CostEstimate(
        flops=2 * B * D * D,
        transcendentals=B * D,                       # sqrt
        bytes_accessed=(3 * B * D + D * D + D) * itemsize,
    )

    out = pl.pallas_call(
        _model_kernel,
        out_shape=jax.ShapeDtypeStruct((B, D), x1.dtype),
        grid=grid,
        in_specs=[
            pl.BlockSpec((tile, D), lambda i: (i, 0)),   # x1 row tile
            pl.BlockSpec((tile, D), lambda i: (i, 0)),   # x2 row tile
            pl.BlockSpec((D, D), lambda i: (0, 0)),      # W^T (VMEM-resident)
            pl.BlockSpec((1, D), lambda i: (0, 0)),      # bias (VMEM-resident)
        ],
        out_specs=pl.BlockSpec((tile, D), lambda i: (i, 0)),
        compiler_params=pltpu.CompilerParams(
            dimension_semantics=("parallel",),
            vmem_limit_bytes=32 * 1024 * 1024,
        ),
        cost_estimate=cost,
    )(x1, x2, w_t, b2)

    return out


if __name__ == "__main__":
    # Small shapes consistent with the forward: D_in = 24 (Linear in_features),
    # batch = 2.  D_out = D_in (see TODO above).
    B, D = 2, 24

    key = jax.random.PRNGKey(0)
    k_x1, k_x2, k_w, k_b = jax.random.split(key, 4)

    x1 = jax.random.normal(k_x1, (B, D), dtype=jnp.float32)
    # keep x2 >= 0 so sqrt is finite in the demo (negative inputs -> NaN in
    # both torch and JAX, identically)
    x2 = jax.random.uniform(k_x2, (B, D), dtype=jnp.float32,
                            minval=0.0, maxval=2.0)

    # Deterministic torch-style Linear init: uniform(-1/sqrt(fan_in), +...)
    bound = 1.0 / (D ** 0.5)
    w = jax.random.uniform(k_w, (D, D), dtype=jnp.float32,
                           minval=-bound, maxval=bound)
    b = jax.random.uniform(k_b, (D,), dtype=jnp.float32,
                           minval=-bound, maxval=bound)

    out = model_forward(x1, x2, w, b)
    out = jax.block_until_ready(out)

    # pure-JAX reference check
    ref = jnp.sqrt(x2) + (x2 @ w.T + b) - x1
    assert out.shape == (B, D)
    assert jnp.allclose(out, ref, atol=1e-5, rtol=1e-5), "mismatch vs reference"

    print("KERNEL_OK")
</pallas_src>

<mosaic_0001>
module attributes {stable_mosaic.version = 11 : i64} {
  func.func @_model_kernel(%arg0: i32, %arg1: memref<2x24xf32, #tpu.memory_space<vmem>>, %arg2: memref<2x24xf32, #tpu.memory_space<vmem>>, %arg3: memref<24x24xf32, #tpu.memory_space<vmem>>, %arg4: memref<1x24xf32, #tpu.memory_space<vmem>>, %arg5: memref<2x24xf32, #tpu.memory_space<vmem>>) attributes {dimension_semantics = [#tpu.dimension_semantics<parallel>], iteration_bounds = array<i64: 1>, scalar_prefetch = 0 : i64, scratch_operands = 0 : i64, tpu.core_type = #tpu.core_type<tc>, window_params = [{transform_indices = @transform_0, window_bounds = array<i64: 2, 24>}, {transform_indices = @transform_1, window_bounds = array<i64: 2, 24>}, {pipeline_mode = #tpu.pipeline_mode<synchronous>, transform_indices = @transform_2, window_bounds = array<i64: 24, 24>}, {pipeline_mode = #tpu.pipeline_mode<synchronous>, transform_indices = @transform_3, window_bounds = array<i64: 1, 24>}, {transform_indices = @transform_4, window_bounds = array<i64: 2, 24>}]} {
    %c0 = arith.constant 0 : index
    %c0_0 = arith.constant 0 : index
    %0 = vector.load %arg2[%c0, %c0_0] : memref<2x24xf32, #tpu.memory_space<vmem>>, vector<2x24xf32>
    %1 = math.sqrt %0 : vector<2x24xf32>
    %c0_1 = arith.constant 0 : index
    %c0_2 = arith.constant 0 : index
    %2 = vector.load %arg3[%c0_1, %c0_2] : memref<24x24xf32, #tpu.memory_space<vmem>>, vector<24x24xf32>
    %cst = arith.constant dense<0.000000e+00> : vector<2x24xf32>
    %3 = tpu.matmul %0, %2, %cst {dimension_numbers = #tpu.dot_dimension_numbers<[1], [0], [0], [1], [0, 0, 1, 1], [], []>} : vector<2x24xf32>, vector<24x24xf32>, vector<2x24xf32> -> vector<2x24xf32>
    %4 = arith.addf %1, %3 : vector<2x24xf32>
    %c0_3 = arith.constant 0 : index
    %c0_4 = arith.constant 0 : index
    %5 = vector.load %arg4[%c0_3, %c0_4] : memref<1x24xf32, #tpu.memory_space<vmem>>, vector<1x24xf32>
    %6 = vector.broadcast %5 : vector<1x24xf32> to vector<2x24xf32>
    %7 = arith.addf %4, %6 : vector<2x24xf32>
    %c0_5 = arith.constant 0 : index
    %c0_6 = arith.constant 0 : index
    %8 = vector.load %arg1[%c0_5, %c0_6] : memref<2x24xf32, #tpu.memory_space<vmem>>, vector<2x24xf32>
    %9 = arith.subf %7, %8 : vector<2x24xf32>
    %c0_7 = arith.constant 0 : index
    %c0_8 = arith.constant 0 : index
    %10 = vector.load %arg5[%c0_7, %c0_8] : memref<2x24xf32, #tpu.memory_space<vmem>>, vector<2x24xf32>
    tpu.vector_store %arg5[%c0_7, %c0_8], %9 {strides = array<i32>} : memref<2x24xf32, #tpu.memory_space<vmem>>, vector<2x24xf32>,
    return
  }
  func.func @transform_0(%arg0: i32) -> (i32, i32) {
    %c0_i32 = arith.constant 0 : i32
    %c0_i32_0 = arith.constant 0 : i32
    return %arg0, %c0_i32 : i32, i32
  }
  func.func @transform_1(%arg0: i32) -> (i32, i32) {
    %c0_i32 = arith.constant 0 : i32
    %c0_i32_0 = arith.constant 0 : i32
    return %arg0, %c0_i32 : i32, i32
  }
  func.func @transform_2(%arg0: i32) -> (i32, i32) {
    %c0_i32 = arith.constant 0 : i32
    %c0_i32_0 = arith.constant 0 : i32
    %c0_i32_1 = arith.constant 0 : i32
    return %c0_i32, %c0_i32_0 : i32, i32
  }
  func.func @transform_3(%arg0: i32) -> (i32, i32) {
    %c0_i32 = arith.constant 0 : i32
    %c0_i32_0 = arith.constant 0 : i32
    %c0_i32_1 = arith.constant 0 : i32
    return %c0_i32, %c0_i32_0 : i32, i32
  }
  func.func @transform_4(%arg0: i32) -> (i32, i32) {
    %c0_i32 = arith.constant 0 : i32
    %c0_i32_0 = arith.constant 0 : i32
    return %arg0, %c0_i32 : i32, i32
  }
}

</mosaic_0001>

<bundles_post_ra>
// kernel: tpu_custom_call.1
= control target key start
LH: loop header
LB: loop body
LE: loop exit
PB: predicated region body
PF: predicated region fallthrough
CT: control target
= control target key end

     0   :  { %9 = vsyncpa [#allocation3], 0  ;;  %s340_s0 = inlined_call_operand.hbm [shape: f32[2,24], index: 0, kind: input, shape index: {}]   ;;  %s341_s1 = inlined_call_operand.vmem [shape: f32[2,24], index: 1, kind: input, shape index: {}]   ;;  %s342_s2 = inlined_call_operand.hbm [shape: f32[24,24], index: 2, kind: input, shape index: {}]   ;;  %s343_s3 = inlined_call_operand.vmem [shape: f32[1,24], index: 3, kind: input, shape index: {}]   ;;  %s344_s4 = inlined_call_operand.hbm [shape: f32[2,24], index: 4, kind: output, shape index: {}]  }
   0x1   :  { %10 = vsyncpa [#allocation6], 0 }
   0x2   :  { %11 = vsyncpa [#allocation4], 0  ;;  %s258_s15 = smov [#allocation2]   ;;  %s259_s17 = smov [#allocation5]  }
   0x3   :  { %s18_s16 = sshll.u32 %s258_s15, 4  ;;  %s29_s18 = sshll.u32 %s259_s17, 4  ;;  %s19_s16 = int_to_ptr.vmem [resolvable:$true] %s18_s16  ;;  %s291_s18 = int_to_ptr.vmem [resolvable:$true] %s29_s18 }
   0x4   :  { %s186_s21 = scalar_lea.hbm %s340_s0, 32 }
   0x5   :  { %p187_p0 = scmp.ne.s32.totalorder %s340_s0, %s186_s21  ;;  %p190_p1 = scmp.lt.u32.totalorder %s186_s21, %s340_s0 }
   0x7   :  { %p192_p2 = pnand %p190_p1, %p187_p0 }
   0x9   :  { %195 = shalt.err (!%p192_p2)
}
   0xa   :  { %s196_s26 = scalar_lea.vmem %s19_s16, 32  ;;  %p201_p4 = scmp.lt.s32.totalorder %s19_s16, %s19_s16 }
   0xb   :  { %p197_p3 = scmp.ne.s32.totalorder %s19_s16, %s196_s26  ;;  %p202_p5 = scmp.lt.s32.totalorder %s196_s26, %s196_s26 }
   0xd   :  { %p203_p6 = por %p202_p5, %p201_p4 }
   0xf   :  { %p204_p7 = pnand %p203_p6, %p197_p3 }
  0x11   :  { %207 = shalt.err (!%p204_p7)
}
  0x12   :  { %21 = dma.hbm_to_vmem [thread:$0]  %s340_s0, 32, %s19_s16, [#allocation3]  }
  0x13   :  { %s208_s5 = scalar_lea.hbm %s342_s2, 384 }
  0x14   :  { %p209_p8 = scmp.ne.s32.totalorder %s342_s2, %s208_s5  ;;  %p212_p9 = scmp.lt.u32.totalorder %s208_s5, %s342_s2 }
  0x16   :  { %p214_p10 = pnand %p212_p9, %p209_p8 }
  0x18   :  { %217 = shalt.err (!%p214_p10)
}
  0x19   :  { %s218_s10 = scalar_lea.vmem %s291_s18, 384  ;;  %p223_p12 = scmp.lt.s32.totalorder %s291_s18, %s291_s18 }
  0x1a   :  { %p219_p11 = scmp.ne.s32.totalorder %s291_s18, %s218_s10  ;;  %p224_p13 = scmp.lt.s32.totalorder %s218_s10, %s218_s10 }
  0x1c   :  { %p225_p0 = por %p224_p13, %p223_p12 }
  0x1e   :  { %p226_p1 = pnand %p225_p0, %p219_p11 }
  0x20   :  { %229 = shalt.err (!%p226_p1)
}
  0x21   :  { %s260_s0 = smov 128   ;;  %s261_s11 = smov 8  }
  0x22   :  { %35 = dma.hbm_to_vmem [thread:$0]  %s342_s2, 384, %s291_s18, [#allocation6], %s260_s0, %s260_s0, %s261_s11  }
  0x23   :  { %252 = dma.done.wait [#allocation3], 32  }
  0x24   :  { %253 = vsyncadd [#allocation3], 4294967264 }
  0x25   :  { %254 = dma.done.wait [#allocation6], 384  }
  0x26   :  { %255 = vsyncadd [#allocation6], 4294966912  ;;  %v262_v0 = vmov 0.0|0.0   ;;  %vm263_vm0 = vmmov 0   ;;  %v264_v1 = vmov 0.0   ;;  %v52_v2 = vld [vmem:[#allocation5] sm:$0xff] }
  0x27   :  { %173 = vmatprep.subr.bf16.mxu0 %v262_v0  ;;  %170 = vmatprep.mubr.msk.f32.mxu0 %vm263_vm0, %v264_v1  ;;  %v53_v3 = vld [vmem:[#allocation5 + $0x8] sm:$0xff]  ;;  %v54_v5 = vld [vmem:[#allocation5 + $0x10] sm:$0xff]  ;;  %v44_v6 = vld [vmem:[%s341_s1] sm:$0x3]  ;;  %vm55_vm1 = vcmask 195584   ;;  %s265_s1 = smov [#allocation7]  }
  0x28   :  { %v174_v4 = vpack.c.bf16 %v53_v3, %v52_v2  ;;  %184 = vrsqrt.f32 %v44_v6  ;;  %vm47_vm2 = vcmp.eq.f32.partialorder %v44_v6, inf  ;;  %v50_v9 = vand.u32 2147483648, %v44_v6  ;;  %v159_v13 = vld [vmem:[%s343_s3] ss:$0 sm:$0xff]  ;;  %s148_s17 = sshll.u32 %s265_s1, 4  ;;  %s149_s17 = int_to_ptr.vmem [resolvable:$true] %s148_s17 }
  0x29   :  { %vm49_vm3 = vcmp.eq.f32.partialorder %v44_v6, 0.0  ;;  %v138_v16 = vld [vmem:[#allocation2] sm:$0x3]  ;;  %vm140_vm4 = vcmask 189440   ;;  %s230_s18 = scalar_lea.vmem %s149_s17, 32  ;;  %p235_p3 = scmp.lt.s32.totalorder %s149_s17, %s149_s17 }
  0x2a   :  { %175 = vmatpush3.bf16.msra.mxu0 %v174_v4  ;;  %p231_p2 = scmp.ne.s32.totalorder %s149_s17, %s230_s18  ;;  %p236_p4 = scmp.lt.s32.totalorder %s230_s18, %s230_s18 }
  0x2b   :  { %168 = vmatprep.subr.mxu0 %v264_v1 }
  0x2c   :  { %p237_p5 = por %p236_p4, %p235_p3 }
  0x2e   :  { %169 = vmatpush3.msra.mxu0 %v54_v5  ;;  %p238_p6 = pnand %p237_p5, %p231_p2 }
  0x2f   :  { %171 = vmatmul.mubr.msk.f32.vlgmr.msra.gmra.mrb[0].mxu0 %vm55_vm1, %v44_v6 }
  0x32   :  { %v185_v7 = vpop.eup %184 }
  0x33   :  { %v46_v8 = vmul.f32 %v185_v7, %v44_v6 }
  0x35   :  { %v48_v10 = vsel %vm47_vm2, %v44_v6, %v46_v8 }
  0x36   :  { %v51_v11 = vsel %vm49_vm3, %v50_v9, %v48_v10 }
 0x102   :  { %v125_v12 = vpop.f32.mrb[0].mxu0 }
 0x103   :  { %v129_v14 = vadd.f32 %v125_v12, %v51_v11  ;;  %v172_v15 = vpop.f32.mrb[1].mxu0 }
 0x105   :  { %v137_v17 = vadd.f32 %v159_v13, %v129_v14 }
 0x107   :  { %v139_v18 = vsub.f32 %v137_v17, %v138_v16 }
 0x109   :  { %141 = vst.msk [vmem:[#allocation7] sm:$0x3] %vm140_vm4, %v139_v18 }
 0x10a   :  { %241 = shalt.err (!%p238_p6)
}
 0x10b   :  { %s242_s3 = scalar_lea.hbm %s344_s4, 32 }
 0x10c   :  { %p243_p7 = scmp.ne.s32.totalorder %s344_s4, %s242_s3  ;;  %p246_p8 = scmp.lt.u32.totalorder %s242_s3, %s344_s4 }
 0x10e   :  { %p248_p9 = pnand %p246_p8, %p243_p7 }
 0x110   :  { %251 = shalt.err (!%p248_p9)
}
 0x111   :  { %151 = dma.vmem_to_hbm [thread:$0]  %s149_s17, 32, %s344_s4, [#allocation4]  }
 0x112   :  { %256 = dma.done.wait [#allocation4], 32  }
 0x113   :  { %257 = vsyncadd [#allocation4], 4294967264 }
 0x114   :  { %155 = vsyncpa [#allocation3], 1 }
 0x115   :  { %156 = vsyncpa [#allocation6], 1 }
 0x116   :  { %157 = vsyncpa [#allocation4], 1 }

</bundles_post_ra>
